<compile_context>
chip_gen: v5e
topology: v5e:2x2
jax: 0.10.0
libtpu: 0.0.40
codegen_flags: <defaults>
</compile_context>

<pallas_src>
import jax
import jax.numpy as jnp
from jax.experimental import pallas as pl
from jax.experimental.pallas import tpu as pltpu


def _avg_pool1d_matmul_kernel(x_ref, p_ref, o_ref):
    """x_ref: (bm, L); p_ref: (L, L_out) banded pooling matrix; o_ref: (bm, L_out)."""
    o_ref[...] = jnp.dot(
        x_ref[...], p_ref[...], preferred_element_type=jnp.float32
    ).astype(o_ref.dtype)


def _pick_row_tile(m: int, bytes_per_row: int, budget_bytes: int) -> int:
    """Rows per grid step: a multiple of 8 dividing m, sized to the VMEM budget;
    forced to >= 2 blocks when m allows (v7x has 2 TensorCores per chip)."""
    bm = max(1, budget_bytes // max(bytes_per_row, 1))
    bm = min(bm, m)
    if bm >= m:
        if m % 16 == 0:
            return m // 2  # two parallel blocks -> both v7x TCs busy
        return m           # full dim (valid BlockSpec even if m is not 8-aligned)
    bm = max(8, (bm // 8) * 8)
    while bm >= 8 and m % bm != 0:
        bm -= 8
    return bm if bm >= 8 else m


def mean_pooler(
    x: jax.Array,
    kernel_size: int,
    stride: int,
    *,
    tile_in_budget_bytes: int = 6 * 1024 * 1024,
) -> jax.Array:
    """Pallas equivalent of MeanPooler.forward (nn.AvgPool1d(kernel_size, stride))."""
    n, c, l = x.shape
    l_out = (l - kernel_size) // stride + 1
    assert l_out >= 1, "input length too small for this kernel_size/stride"

    if not jnp.issubdtype(x.dtype, jnp.floating):
        x = x.astype(jnp.float32)

    # Banded pooling matrix P: P[i, j] = 1/k  iff  j*stride <= i < j*stride + k.
    rows = jnp.arange(l, dtype=jnp.int32)[:, None]
    starts = (jnp.arange(l_out, dtype=jnp.int32) * stride)[None, :]
    p = jnp.where(
        (rows >= starts) & (rows < starts + kernel_size),
        jnp.asarray(1.0 / kernel_size, jnp.float32),
        jnp.asarray(0.0, jnp.float32),
    ).astype(x.dtype)
    # TODO(synk): for very long sequences, band/tile P along L (K-reduction grid
    # axis with an f32 accumulator) instead of keeping a dense (L, L_out) P
    # resident in VMEM.

    m = n * c
    x_rows = x.reshape(m, l)  # collapse leading dims only: no HBM transpose pass

    itemsize = jnp.dtype(x.dtype).itemsize
    bytes_per_row = (l + l_out) * itemsize
    bm = _pick_row_tile(m, bytes_per_row, tile_in_budget_bytes)
    grid = (m // bm,)

    out_rows = pl.pallas_call(
        _avg_pool1d_matmul_kernel,
        out_shape=jax.ShapeDtypeStruct((m, l_out), x.dtype),
        grid=grid,
        in_specs=[
            pl.BlockSpec((bm, l), lambda i: (i, 0)),
            # Grid-invariant block index -> the pooling matrix is DMA'd once and
            # stays resident in VMEM for the whole grid.
            pl.BlockSpec((l, l_out), lambda i: (0, 0)),
        ],
        out_specs=pl.BlockSpec((bm, l_out), lambda i: (i, 0)),
        compiler_params=pltpu.CompilerParams(
            dimension_semantics=("parallel",),
            # Conservative: leaves headroom on v7x (64 MiB VMEM/TC); v5e/v6e
            # (128 MiB) could go higher but gains there are single-digit %.
            vmem_limit_bytes=32 * 1024 * 1024,
        ),
    )(x_rows, p)

    # Back to PyTorch AvgPool1d layout (N, C, L_out) — leading-dim split, no copy.
    return out_rows.reshape(n, c, l_out)


def _reference(x: jax.Array, kernel_size: int, stride: int) -> jax.Array:
    l_out = (x.shape[-1] - kernel_size) // stride + 1
    return jnp.stack(
        [
            jnp.mean(x[:, :, j * stride: j * stride + kernel_size], axis=-1)
            for j in range(l_out)
        ],
        axis=-1,
    )


if __name__ == "__main__":
    # MeanPooler(kernel_size=4, stride=2); the module has no learnable parameters.
    kernel_size, stride = 4, 2
    key = jax.random.PRNGKey(0)

    # Inputs are snapped to bf16-representable values so the correctness check is
    # insensitive to how the backend schedules f32 passes through the MXU.
    def _snap(v):
        return v.astype(jnp.bfloat16).astype(jnp.float32)

    # Small demo shape in PyTorch AvgPool1d NCL layout: (batch=2, channels=4, seq_len=16).
    x = _snap(jax.random.normal(key, (2, 4, 16), dtype=jnp.float32))
    out = jax.block_until_ready(mean_pooler(x, kernel_size, stride))
    ref = _reference(x, kernel_size, stride)
    assert out.shape == ref.shape, (out.shape, ref.shape)
    assert jnp.allclose(out, ref, atol=1e-5, rtol=1e-5), "mismatch vs reference (small)"

    # Second case exercising the tiled, multi-block "parallel" grid path
    # (tiny budget forces bm=32 -> grid=(16,); C=128, L=64).
    x2 = _snap(jax.random.normal(jax.random.PRNGKey(0), (4, 128, 64), dtype=jnp.float32))
    out2 = jax.block_until_ready(
        mean_pooler(x2, kernel_size, stride, tile_in_budget_bytes=16 * 1024)
    )
    ref2 = _reference(x2, kernel_size, stride)
    assert out2.shape == ref2.shape, (out2.shape, ref2.shape)
    assert jnp.allclose(out2, ref2, atol=1e-5, rtol=1e-5), "mismatch vs reference (tiled)"

    print("KERNEL_OK")
</pallas_src>

<mosaic_0001>
module attributes {stable_mosaic.version = 11 : i64} {
  func.func @_avg_pool1d_matmul_kernel(%arg0: i32, %arg1: memref<8x16xf32, #tpu.memory_space<vmem>>, %arg2: memref<16x7xf32, #tpu.memory_space<vmem>>, %arg3: memref<8x7xf32, #tpu.memory_space<vmem>>) attributes {dimension_semantics = [#tpu.dimension_semantics<parallel>], iteration_bounds = array<i64: 1>, scalar_prefetch = 0 : i64, scratch_operands = 0 : i64, tpu.core_type = #tpu.core_type<tc>, window_params = [{transform_indices = @transform_0, window_bounds = array<i64: 8, 16>}, {pipeline_mode = #tpu.pipeline_mode<synchronous>, transform_indices = @transform_1, window_bounds = array<i64: 16, 7>}, {transform_indices = @transform_2, window_bounds = array<i64: 8, 7>}]} {
    %c0 = arith.constant 0 : index
    %c0_0 = arith.constant 0 : index
    %0 = vector.load %arg1[%c0, %c0_0] : memref<8x16xf32, #tpu.memory_space<vmem>>, vector<8x16xf32>
    %c0_1 = arith.constant 0 : index
    %c0_2 = arith.constant 0 : index
    %1 = vector.load %arg2[%c0_1, %c0_2] : memref<16x7xf32, #tpu.memory_space<vmem>>, vector<16x7xf32>
    %cst = arith.constant dense<0.000000e+00> : vector<8x7xf32>
    %2 = tpu.matmul %0, %1, %cst {dimension_numbers = #tpu.dot_dimension_numbers<[1], [0], [0], [1], [0, 0, 1, 1], [], []>} : vector<8x16xf32>, vector<16x7xf32>, vector<8x7xf32> -> vector<8x7xf32>
    %c0_3 = arith.constant 0 : index
    %c0_4 = arith.constant 0 : index
    %3 = vector.load %arg3[%c0_3, %c0_4] : memref<8x7xf32, #tpu.memory_space<vmem>>, vector<8x7xf32>
    tpu.vector_store %arg3[%c0_3, %c0_4], %2 {strides = array<i32>} : memref<8x7xf32, #tpu.memory_space<vmem>>, vector<8x7xf32>,
    return
  }
  func.func @transform_0(%arg0: i32) -> (i32, i32) {
    %c0_i32 = arith.constant 0 : i32
    %c0_i32_0 = arith.constant 0 : i32
    return %arg0, %c0_i32 : i32, i32
  }
  func.func @transform_1(%arg0: i32) -> (i32, i32) {
    %c0_i32 = arith.constant 0 : i32
    %c0_i32_0 = arith.constant 0 : i32
    %c0_i32_1 = arith.constant 0 : i32
    return %c0_i32, %c0_i32_0 : i32, i32
  }
  func.func @transform_2(%arg0: i32) -> (i32, i32) {
    %c0_i32 = arith.constant 0 : i32
    %c0_i32_0 = arith.constant 0 : i32
    return %arg0, %c0_i32 : i32, i32
  }
}

</mosaic_0001>

<bundles_post_ra>
// kernel: tpu_custom_call.1
= control target key start
LH: loop header
LB: loop body
LE: loop exit
PB: predicated region body
PF: predicated region fallthrough
CT: control target
= control target key end

     0   :  { %vm15_vm0 = vcmask 130048   ;;  %s113_s0 = inlined_call_operand.vmem [shape: f32[8,16], index: 0, kind: input, shape index: {}]   ;;  %s114_s1 = inlined_call_operand.vmem [shape: f32[16,7], index: 1, kind: input, shape index: {}]   ;;  %s115_s2 = inlined_call_operand.hbm [shape: f32[8,7], index: 2, kind: output, shape index: {}]  }
   0x1   :  { %v14_v0 = vld [vmem:[%s114_s1 + $0x8] sm:$0xff]  ;;  %v13_v1 = vld [vmem:[%s114_s1] sm:$0xff] }
   0x2   :  { %33 = vmatpush.msra.mxu0 %v14_v0  ;;  %v12_v2 = vld [vmem:[%s113_s0] sm:$0xff] }
   0x3   :  { %7 = vsyncpa [#allocation3], 0  ;;  %s85_s15 = smov [#allocation2]   ;;  %s48_s19 = sshll.u32 %s115_s2, 4  ;;  %vm39_vm1 = vcmask 56320   ;;  %s49_s19 = int_to_ptr.hbm [resolvable:$true] %s48_s19 }
   0x4   :  { %34 = vmatpush.msra.mxu0 %v13_v1  ;;  %s46_s16 = sshll.u32 %s85_s15, 4  ;;  %s47_s16 = int_to_ptr.vmem [resolvable:$true] %s46_s16 }
   0x5   :  { %57 = vmatmul.msk.f32.vlgmr.msra.gmra.mxu0 %vm15_vm0, %v12_v2 }
  0x82   :  { %v36_v3 = vpop.f32.mrf.mxu0 }
  0x83   :  { %40 = vst.msk [vmem:[#allocation2] sm:$0xff] %vm39_vm1, %v36_v3 }
  0x84   :  { %51 = dma.vmem_to_hbm [thread:$0]  %s47_s16, 128, %s49_s19, [#allocation3]  }
  0x85   :  { %83 = dma.done.wait [#allocation3], 128  }
  0x86   :  { %84 = vsyncadd [#allocation3], 4294967168 }
  0x87   :  { %56 = vsyncpa [#allocation3], 1 }

</bundles_post_ra>
